<compile_context>
chip_gen: v5e
topology: v5e:2x2
jax: 0.10.0
libtpu: 0.0.40
codegen_flags: <defaults>
</compile_context>

<pallas_src>
import functools

import jax
import jax.numpy as jnp
import numpy as np
from jax import lax
from jax.experimental import pallas as pl
from jax.experimental.pallas import tpu as pltpu

EPS = 1e-3                      # BatchNorm eps (module uses eps=0.001)
MATMUL_DTYPE = jnp.bfloat16     # MXU-native; f32 accumulation keeps accuracy ~2e-2
OUT_DTYPE = jnp.float32         # set to bf16 if the downstream block tolerates it


def _silu(v):
    return v * jax.nn.sigmoid(v)


# ------------------------------ fused kernel -------------------------------- #

def _make_kernel(TR, Wh, C1, C2):
    """Fused MaxPool+cv1 / cv2+cv3 / concat kernel for one (batch, row-block) tile.

    Per grid step (b, r):
      xm_ref    : (1, 2*TR*Wh, 2*C1) bf16   x rows [2*r*TR, 2*(r+1)*TR), col pairs in lanes
      w1,w2     : (C1, C2) bf16             BN-folded 1x1 conv weights
      w3        : (9, C2, C2) bf16          BN-folded 3x3 conv, tap k = kh*3 + kw
      b1..b3    : (1, C2) f32
      o_ref     : (1, TR*Wh, 2*C2)          [cv3-branch | maxpool/cv1-branch] lanes
      yprev_ref : (2, Wh, C2) bf16 scratch  previous block's last cv2 row (E, O) carry
    """

    def kernel(xm_ref, w1_ref, b1_ref, w2_ref, b2_ref, w3_ref, b3_ref,
               o_ref, yprev_ref):
        r = pl.program_id(1)

        # top of the image: the carried halo row is conv zero-padding -> cv2(0-pad)=0 row of y2
        @pl.when(r == 0)
        def _():
            yprev_ref[...] = jnp.zeros((2, Wh, C2), yprev_ref.dtype)

        def mm(a, w):
            return jnp.dot(a, w, preferred_element_type=jnp.float32)

        xm = xm_ref[0]                                   # (2*TR*Wh, 2*C1) bf16
        xe = xm[:, :C1]                                  # even image columns
        xo = xm[:, C1:]                                  # odd image columns

        # -------- branch 1: MaxPool2d(2,2) + cv1 (1x1 conv + SiLU) -------------
        x4 = xm.reshape(TR, 2, Wh, 2 * C1)               # split row pairs (leading dims)
        xr = jnp.maximum(x4[:, 0], x4[:, 1])             # max over row pair
        mp = jnp.maximum(xr[..., :C1], xr[..., C1:])     # max over column pair (lanes)
        y1 = _silu(mm(mp.reshape(TR * Wh, C1), w1_ref[...]) + b1_ref[...])

        # -------- branch 2: cv2 (1x1 conv + SiLU), then cv3 (3x3, s2, p1) ------
        w2 = w2_ref[...]
        b2 = b2_ref[...]
        y2e = _silu(mm(xe, w2) + b2)                     # (2*TR*Wh, C2) f32, even cols
        y2o = _silu(mm(xo, w2) + b2)                     # odd cols

        dt = xm.dtype
        y2e3 = y2e.astype(dt).reshape(TR, 2, Wh, C2)     # (row-pair, parity, col-pair, C2)
        y2o3 = y2o.astype(dt).reshape(TR, 2, Wh, C2)

        # row sets needed by the stride-2 3x3 conv: y2 local rows (2*i' - 1 + kh)
        Eev, Eod = y2e3[:, 0], y2e3[:, 1]                # kh=1 / kh=2, even cols
        Oev, Ood = y2o3[:, 0], y2o3[:, 1]                # kh=1 / kh=2, odd cols
        pE = yprev_ref[0][None]                          # (1, Wh, C2) image row 2*r*TR-1
        pO = yprev_ref[1][None]
        if TR > 1:                                       # kh=0 rows: [prev, odd rows[:-1]]
            E0 = jnp.concatenate([pE, Eod[:TR - 1]], axis=0)
            O0 = jnp.concatenate([pO, Ood[:TR - 1]], axis=0)
        else:
            E0, O0 = pE, pO

        def colshift(p):                                 # tap col 2j-1 = odd col of pair j-1
            if Wh == 1:
                return jnp.zeros_like(p)
            z = jnp.zeros((p.shape[0], 1, C2), p.dtype)
            return jnp.concatenate([z, p[:, :Wh - 1, :]], axis=1)

        O0s, Oevs, Oods = colshift(O0), colshift(Oev), colshift(Ood)

        def tap(p, k):                                   # one 3x3 tap: (TR*Wh,C2)x(C2,C2)
            return mm(p.reshape(TR * Wh, C2), w3_ref[k])

        acc = tap(O0s, 0) + tap(E0, 1) + tap(O0, 2)      # kh = 0
        acc = acc + tap(Oevs, 3) + tap(Eev, 4) + tap(Oev, 5)   # kh = 1
        acc = acc + tap(Oods, 6) + tap(Eod, 7) + tap(Ood, 8)   # kh = 2
        y3 = _silu(acc + b3_ref[...])                    # (TR*Wh, C2)

        # carry this block's last y2 row (image row 2*(r+1)*TR - 1) to the next block
        yprev_ref[0] = y2e3[TR - 1, 1]
        yprev_ref[1] = y2o3[TR - 1, 1]

        # torch.cat([x_2, x_1], dim=1): two lane-aligned sub-stores, no concat copy
        o_ref[0, :, :C2] = y3.astype(o_ref.dtype)
        o_ref[0, :, C2:] = y1.astype(o_ref.dtype)

    return kernel


# ------------------------------ tiling helpers ------------------------------- #

@functools.lru_cache(maxsize=None)
def _vmem_capacity_bytes():
    try:
        cap = getattr(pltpu.get_tpu_info(), "vmem_capacity_bytes", None)
        if cap:
            return int(cap)
    except Exception:
        pass
    return 64 * 1024 * 1024          # v7x-safe default


def _block_vmem_bytes(TR, Wh, C1, C2):
    """Rough per-grid-step VMEM footprint (bytes) used to choose TR."""
    px = TR * Wh
    ib = np.dtype(MATMUL_DTYPE).itemsize
    ob = np.dtype(OUT_DTYPE).itemsize
    x_blk = 2 * px * 2 * C1 * ib * 2                      # input block, double-buffered
    o_blk = px * 2 * C2 * ob * 2                          # output block, double-buffered
    weights = (2 * C1 * C2 + 9 * C2 * C2) * ib + 3 * C2 * 4
    # in-kernel temporaries: y2 (f32 + bf16), up to 9 cv3 LHS tiles, f32 acc, y1,
    # maxpool temporaries.
    tmp = px * C2 * (2 * 4 + 2 * ib + 9 * ib + 4 + 4) + 3 * px * C1 * ib
    return x_blk + o_blk + weights + tmp


def _pick_tile_rows(B, Hh, Wh, C1, C2, requested, budget_bytes):
    """Largest divisor of Hh whose block fits the VMEM budget (keeps both v7x cores fed)."""
    if requested is not None:
        tr = int(max(1, min(Hh, requested)))
        while Hh % tr:
            tr -= 1
        return tr
    # TODO(synk): non-divisor tile sizes (masked last block) not implemented; awkward Hh
    # degrades toward TR=1 (correct, slower).
    cap = Hh if (B > 1 or Hh == 1) else max(1, Hh // 2)   # B==1: leave R>=2 for megacore
    best = 1
    for d in range(1, Hh + 1):
        if Hh % d == 0 and d <= cap and _block_vmem_bytes(d, Wh, C1, C2) <= budget_bytes:
            best = d
    return best


# ------------------------------ forward wrapper ----------------------------- #

@functools.partial(jax.jit, static_argnames=("tile_out_rows", "channels_last"))
def transition_block_forward(x, params, *, tile_out_rows=None, channels_last=False):
    # NCHW -> NHWC only at the module interface; pass channels_last=True to keep NHWC
    # end-to-end and avoid the two HBM-round-trip transposes.
    x = x.astype(MATMUL_DTYPE)
    if not channels_last:
        x = jnp.transpose(x, (0, 2, 3, 1))                 # (B, H, W, C1)
    B, H, W, C1 = x.shape
    assert H % 2 == 0 and W % 2 == 0, "Transition_Block needs even spatial dims"
    Hh, Wh = H // 2, W // 2
    C2 = params["w1"].shape[1]
    assert params["w1"].shape[0] == C1

    # FREE reshape: fold column pairs into lanes, flatten (H, Wh) into one row axis.
    xw = x.reshape(B, H * Wh, 2 * C1)

    vmem_cap = _vmem_capacity_bytes()
    vmem_limit = min(int(vmem_cap * 0.85), 100 * 1024 * 1024)
    TR = _pick_tile_rows(B, Hh, Wh, C1, C2, tile_out_rows, int(vmem_limit * 0.8))
    R = Hh // TR
    grid = (B, R)

    kern = _make_kernel(TR, Wh, C1, C2)

    # main rows of the block: image rows [2*r*TR, 2*(r+1)*TR)
    xm_spec = pl.BlockSpec((1, 2 * TR * Wh, 2 * C1), lambda b, r: (b, r, 0))
    # resident (non-double-buffered) weights / biases
    wspec = pl.BlockSpec(memory_space=pltpu.MemorySpace.VMEM)

    w1 = params["w1"].astype(MATMUL_DTYPE)
    w2 = params["w2"].astype(MATMUL_DTYPE)
    w3 = params["w3"].astype(MATMUL_DTYPE)
    b1 = params["b1"].astype(jnp.float32)
    b2 = params["b2"].astype(jnp.float32)
    b3 = params["b3"].astype(jnp.float32)

    pixels = B * Hh * Wh
    ib = np.dtype(MATMUL_DTYPE).itemsize
    cost = pl.CostEstimate(
        flops=2 * pixels * (5 * C1 * C2 + 9 * C2 * C2),
        transcendentals=6 * pixels * C2,
        bytes_accessed=(B * H * W * C1 * ib
                        + (2 * C1 * C2 + 9 * C2 * C2) * ib + 3 * C2 * 4
                        + pixels * 2 * C2 * np.dtype(OUT_DTYPE).itemsize),
    )

    out = pl.pallas_call(
        kern,
        out_shape=jax.ShapeDtypeStruct((B, Hh * Wh, 2 * C2), OUT_DTYPE),
        grid_spec=pltpu.PrefetchScalarGridSpec(
            num_scalar_prefetch=0,
            grid=grid,
            in_specs=[xm_spec, wspec, wspec, wspec, wspec, wspec, wspec],
            out_specs=pl.BlockSpec((1, TR * Wh, 2 * C2), lambda b, r: (b, r, 0)),
            scratch_shapes=[pltpu.VMEM((2, Wh, C2), MATMUL_DTYPE)],
        ),
        compiler_params=pltpu.CompilerParams(
            # r carries the cv2 halo row in scratch -> sequential ("arbitrary");
            # batch is independent -> "parallel" (megacore on v7x).
            dimension_semantics=("parallel", "arbitrary"),
            vmem_limit_bytes=vmem_limit),
        cost_estimate=cost,
    )(xw, w1, b1, w2, b2, w3, b3)

    out = out.reshape(B, Hh, Wh, 2 * C2)
    if not channels_last:
        out = jnp.transpose(out, (0, 3, 1, 2))             # back to NCHW
    return out


# --------------------------- parameters (synthetic) -------------------------- #

def make_params(key, c1, c2):
    """Synthetic Conv2d + BatchNorm params; returns BN-folded matmul-form weights for
    the kernel and the raw params for the pure-JAX reference."""
    ks = jax.random.split(key, 16)

    def bn_params(k0, k1, k2, k3, c):
        gamma = 1.0 + 0.1 * jax.random.normal(k0, (c,), jnp.float32)
        beta = 0.1 * jax.random.normal(k1, (c,), jnp.float32)
        mean = 0.1 * jax.random.normal(k2, (c,), jnp.float32)
        var = 1.0 + 0.1 * jnp.abs(jax.random.normal(k3, (c,), jnp.float32))
        return gamma, beta, mean, var

    w1 = 0.1 * jax.random.normal(ks[0], (c2, c1, 1, 1), jnp.float32)   # cv1 (OIHW)
    w2 = 0.1 * jax.random.normal(ks[1], (c2, c1, 1, 1), jnp.float32)   # cv2
    w3 = 0.1 * jax.random.normal(ks[2], (c2, c2, 3, 3), jnp.float32)   # cv3
    bn1 = bn_params(ks[3], ks[4], ks[5], ks[6], c2)
    bn2 = bn_params(ks[7], ks[8], ks[9], ks[10], c2)
    bn3 = bn_params(ks[11], ks[12], ks[13], ks[14], c2)

    def fold(w, bn):
        gamma, beta, mean, var = bn
        scale = gamma / jnp.sqrt(var + EPS)
        return w * scale[:, None, None, None], beta - mean * scale

    w1_f, b1_f = fold(w1, bn1)
    w2_f, b2_f = fold(w2, bn2)
    w3_f, b3_f = fold(w3, bn3)

    params = {
        "w1": w1_f[:, :, 0, 0].T.astype(MATMUL_DTYPE),                # (C1, C2)
        "b1": b1_f.reshape(1, c2).astype(jnp.float32),
        "w2": w2_f[:, :, 0, 0].T.astype(MATMUL_DTYPE),
        "b2": b2_f.reshape(1, c2).astype(jnp.float32),
        # 3x3 conv: tap k = kh*3 + kw, each (C2_in, C2_out)
        "w3": jnp.stack([w3_f[:, :, kh, kw].T for kh in range(3) for kw in range(3)],
                        axis=0).astype(MATMUL_DTYPE),                 # (9, C2, C2)
        "b3": b3_f.reshape(1, c2).astype(jnp.float32),
    }
    raw = {"w1": w1, "w2": w2, "w3": w3, "bn1": bn1, "bn2": bn2, "bn3": bn3}
    return params, raw


# ------------------------- pure-JAX reference (check) ------------------------ #

def reference_forward(x_nchw, raw):
    def conv(x, w, stride, pad):
        return lax.conv_general_dilated(
            x, w, window_strides=(stride, stride),
            padding=((pad, pad), (pad, pad)),
            dimension_numbers=("NCHW", "OIHW", "NCHW"))

    def bn(x, p):
        gamma, beta, mean, var = p
        return ((x - mean[None, :, None, None])
                / jnp.sqrt(var[None, :, None, None] + EPS)
                * gamma[None, :, None, None] + beta[None, :, None, None])

    def silu(x):
        return x * jax.nn.sigmoid(x)

    x1 = lax.reduce_window(x_nchw, -jnp.inf, lax.max,
                           (1, 1, 2, 2), (1, 1, 2, 2), "VALID")
    x1 = silu(bn(conv(x1, raw["w1"], 1, 0), raw["bn1"]))
    x2 = silu(bn(conv(x_nchw, raw["w2"], 1, 0), raw["bn2"]))
    x2 = silu(bn(conv(x2, raw["w3"], 2, 1), raw["bn3"]))
    return jnp.concatenate([x2, x1], axis=1)


# ----------------------------------- main ------------------------------------ #

if __name__ == "__main__":
    key = jax.random.PRNGKey(0)
    k_x, k_p = jax.random.split(key)

    B, C1, H, W = 2, 4, 16, 16
    C2 = 8
    x = jax.random.normal(k_x, (B, C1, H, W), jnp.float32)   # NCHW like PyTorch

    params, raw = make_params(k_p, C1, C2)
    ref = jax.block_until_ready(reference_forward(x, raw))

    # exercise the TR==1 path, the multi-block halo-carry path, and the default tiling
    for trs in (1, 2, None):
        out = jax.block_until_ready(
            transition_block_forward(x, params, tile_out_rows=trs))
        assert out.shape == (B, 2 * C2, H // 2, W // 2), out.shape
        np.testing.assert_allclose(np.asarray(out, dtype=np.float32), np.asarray(ref),
                                   rtol=2e-2, atol=2e-2)

    print("KERNEL_OK")
</pallas_src>

<mosaic_0001>
module attributes {stable_mosaic.version = 11 : i64} {
  func.func @kernel(%arg0: i32, %arg1: i32, %arg2: memref<1x16x8xbf16, #tpu.memory_space<vmem>>, %arg3: memref<4x8xbf16, #tpu.memory_space<vmem>>, %arg4: memref<1x8xf32, #tpu.memory_space<vmem>>, %arg5: memref<4x8xbf16, #tpu.memory_space<vmem>>, %arg6: memref<1x8xf32, #tpu.memory_space<vmem>>, %arg7: memref<9x8x8xbf16, #tpu.memory_space<vmem>>, %arg8: memref<1x8xf32, #tpu.memory_space<vmem>>, %arg9: memref<1x8x16xf32, #tpu.memory_space<vmem>>, %arg10: memref<2x8x8xbf16, #tpu.memory_space<vmem>>) attributes {dimension_semantics = [#tpu.dimension_semantics<parallel>, #tpu.dimension_semantics<arbitrary>], iteration_bounds = array<i64: 2, 8>, scalar_prefetch = 0 : i64, scratch_operands = 1 : i64, tpu.core_type = #tpu.core_type<tc>, window_params = [{transform_indices = @transform_0, window_bounds = array<i64: 1, 16, 8>}, {pipeline_mode = #tpu.pipeline_mode<synchronous>, transform_indices = @transform_1, window_bounds = array<i64: 4, 8>}, {pipeline_mode = #tpu.pipeline_mode<synchronous>, transform_indices = @transform_2, window_bounds = array<i64: 1, 8>}, {pipeline_mode = #tpu.pipeline_mode<synchronous>, transform_indices = @transform_3, window_bounds = array<i64: 4, 8>}, {pipeline_mode = #tpu.pipeline_mode<synchronous>, transform_indices = @transform_4, window_bounds = array<i64: 1, 8>}, {pipeline_mode = #tpu.pipeline_mode<synchronous>, transform_indices = @transform_5, window_bounds = array<i64: 9, 8, 8>}, {pipeline_mode = #tpu.pipeline_mode<synchronous>, transform_indices = @transform_6, window_bounds = array<i64: 1, 8>}, {transform_indices = @transform_7, window_bounds = array<i64: 1, 8, 16>}]} {
    %c0_i32 = arith.constant 0 : i32
    %0 = arith.cmpi eq, %arg1, %c0_i32 : i32
    %1 = arith.extui %0 : i1 to i32
    %c0_i32_0 = arith.constant 0 : i32
    %2 = arith.cmpi ne, %1, %c0_i32_0 : i32
    scf.if %2 {
      %cst_68 = arith.constant 0.000000e+00 : bf16
      %144 = vector.broadcast %cst_68 : bf16 to vector<2x8x8xbf16>
      %c0_69 = arith.constant 0 : index
      %c0_70 = arith.constant 0 : index
      %c0_71 = arith.constant 0 : index
      %145 = vector.load %arg10[%c0_69, %c0_70, %c0_71] : memref<2x8x8xbf16, #tpu.memory_space<vmem>>, vector<2x8x8xbf16>
      tpu.vector_store %arg10[%c0_69, %c0_70, %c0_71], %144 {strides = array<i32>} : memref<2x8x8xbf16, #tpu.memory_space<vmem>>, vector<2x8x8xbf16>,
    } else {
    }
    %c0 = arith.constant 0 : index
    %c0_1 = arith.constant 0 : index
    %c0_2 = arith.constant 0 : index
    %3 = vector.load %arg2[%c0, %c0_1, %c0_2] : memref<1x16x8xbf16, #tpu.memory_space<vmem>>, vector<1x16x8xbf16>
    %4 = vector.shape_cast %3 : vector<1x16x8xbf16> to vector<16x8xbf16>
    %5 = vector.extract_strided_slice %4 {offsets = [0, 0], sizes = [16, 4], strides = [1, 1]} : vector<16x8xbf16> to vector<16x4xbf16>
    %6 = vector.extract_strided_slice %4 {offsets = [0, 4], sizes = [16, 4], strides = [1, 1]} : vector<16x8xbf16> to vector<16x4xbf16>
    %7 = vector.shape_cast %4 : vector<16x8xbf16> to vector<1x2x8x8xbf16>
    %8 = vector.extract_strided_slice %7 {offsets = [0, 0, 0, 0], sizes = [1, 1, 8, 8], strides = [1, 1, 1, 1]} : vector<1x2x8x8xbf16> to vector<1x1x8x8xbf16>
    %9 = vector.shape_cast %8 : vector<1x1x8x8xbf16> to vector<1x8x8xbf16>
    %10 = vector.extract_strided_slice %7 {offsets = [0, 1, 0, 0], sizes = [1, 1, 8, 8], strides = [1, 1, 1, 1]} : vector<1x2x8x8xbf16> to vector<1x1x8x8xbf16>
    %11 = vector.shape_cast %10 : vector<1x1x8x8xbf16> to vector<1x8x8xbf16>
    %12 = arith.maximumf %9, %11 : vector<1x8x8xbf16>
    %13 = vector.extract_strided_slice %12 {offsets = [0, 0, 0], sizes = [1, 8, 4], strides = [1, 1, 1]} : vector<1x8x8xbf16> to vector<1x8x4xbf16>
    %14 = vector.extract_strided_slice %12 {offsets = [0, 0, 4], sizes = [1, 8, 4], strides = [1, 1, 1]} : vector<1x8x8xbf16> to vector<1x8x4xbf16>
    %15 = arith.maximumf %13, %14 : vector<1x8x4xbf16>
    %16 = vector.shape_cast %15 : vector<1x8x4xbf16> to vector<8x4xbf16>
    %c0_3 = arith.constant 0 : index
    %c0_4 = arith.constant 0 : index
    %17 = vector.load %arg3[%c0_3, %c0_4] : memref<4x8xbf16, #tpu.memory_space<vmem>>, vector<4x8xbf16>
    %cst = arith.constant dense<0.000000e+00> : vector<8x8xf32>
    %18 = tpu.matmul %16, %17, %cst {dimension_numbers = #tpu.dot_dimension_numbers<[1], [0], [0], [1], [0, 0, 1, 1], [], []>} : vector<8x4xbf16>, vector<4x8xbf16>, vector<8x8xf32> -> vector<8x8xf32>
    %c0_5 = arith.constant 0 : index
    %c0_6 = arith.constant 0 : index
    %19 = vector.load %arg4[%c0_5, %c0_6] : memref<1x8xf32, #tpu.memory_space<vmem>>, vector<1x8xf32>
    %20 = vector.broadcast %19 : vector<1x8xf32> to vector<8x8xf32>
    %21 = arith.addf %18, %20 : vector<8x8xf32>
    %22 = arith.negf %21 : vector<8x8xf32>
    %23 = math.exp %22 : vector<8x8xf32>
    %cst_7 = arith.constant 1.000000e+00 : f32
    %24 = vector.broadcast %cst_7 : f32 to vector<8x8xf32>
    %25 = arith.addf %24, %23 : vector<8x8xf32>
    %26 = arith.divf %24, %25 : vector<8x8xf32>
    %27 = arith.mulf %21, %26 : vector<8x8xf32>
    %c0_8 = arith.constant 0 : index
    %c0_9 = arith.constant 0 : index
    %28 = vector.load %arg5[%c0_8, %c0_9] : memref<4x8xbf16, #tpu.memory_space<vmem>>, vector<4x8xbf16>
    %c0_10 = arith.constant 0 : index
    %c0_11 = arith.constant 0 : index
    %29 = vector.load %arg6[%c0_10, %c0_11] : memref<1x8xf32, #tpu.memory_space<vmem>>, vector<1x8xf32>
    %cst_12 = arith.constant dense<0.000000e+00> : vector<16x8xf32>
    %30 = tpu.matmul %5, %28, %cst_12 {dimension_numbers = #tpu.dot_dimension_numbers<[1], [0], [0], [1], [0, 0, 1, 1], [], []>} : vector<16x4xbf16>, vector<4x8xbf16>, vector<16x8xf32> -> vector<16x8xf32>
    %31 = vector.broadcast %29 : vector<1x8xf32> to vector<16x8xf32>
    %32 = arith.addf %30, %31 : vector<16x8xf32>
    %33 = arith.negf %32 : vector<16x8xf32>
    %34 = math.exp %33 : vector<16x8xf32>
    %cst_13 = arith.constant 1.000000e+00 : f32
    %35 = vector.broadcast %cst_13 : f32 to vector<16x8xf32>
    %36 = arith.addf %35, %34 : vector<16x8xf32>
    %37 = arith.divf %35, %36 : vector<16x8xf32>
    %38 = arith.mulf %32, %37 : vector<16x8xf32>
    %cst_14 = arith.constant dense<0.000000e+00> : vector<16x8xf32>
    %39 = tpu.matmul %6, %28, %cst_14 {dimension_numbers = #tpu.dot_dimension_numbers<[1], [0], [0], [1], [0, 0, 1, 1], [], []>} : vector<16x4xbf16>, vector<4x8xbf16>, vector<16x8xf32> -> vector<16x8xf32>
    %40 = vector.broadcast %29 : vector<1x8xf32> to vector<16x8xf32>
    %41 = arith.addf %39, %40 : vector<16x8xf32>
    %42 = arith.negf %41 : vector<16x8xf32>
    %43 = math.exp %42 : vector<16x8xf32>
    %cst_15 = arith.constant 1.000000e+00 : f32
    %44 = vector.broadcast %cst_15 : f32 to vector<16x8xf32>
    %45 = arith.addf %44, %43 : vector<16x8xf32>
    %46 = arith.divf %44, %45 : vector<16x8xf32>
    %47 = arith.mulf %41, %46 : vector<16x8xf32>
    %48 = arith.truncf %38 : vector<16x8xf32> to vector<16x8xbf16>
    %49 = vector.shape_cast %48 : vector<16x8xbf16> to vector<1x2x8x8xbf16>
    %50 = arith.truncf %47 : vector<16x8xf32> to vector<16x8xbf16>
    %51 = vector.shape_cast %50 : vector<16x8xbf16> to vector<1x2x8x8xbf16>
    %52 = vector.extract_strided_slice %49 {offsets = [0, 0, 0, 0], sizes = [1, 1, 8, 8], strides = [1, 1, 1, 1]} : vector<1x2x8x8xbf16> to vector<1x1x8x8xbf16>
    %53 = vector.shape_cast %52 : vector<1x1x8x8xbf16> to vector<1x8x8xbf16>
    %54 = vector.extract_strided_slice %49 {offsets = [0, 1, 0, 0], sizes = [1, 1, 8, 8], strides = [1, 1, 1, 1]} : vector<1x2x8x8xbf16> to vector<1x1x8x8xbf16>
    %55 = vector.shape_cast %54 : vector<1x1x8x8xbf16> to vector<1x8x8xbf16>
    %56 = vector.extract_strided_slice %51 {offsets = [0, 0, 0, 0], sizes = [1, 1, 8, 8], strides = [1, 1, 1, 1]} : vector<1x2x8x8xbf16> to vector<1x1x8x8xbf16>
    %57 = vector.shape_cast %56 : vector<1x1x8x8xbf16> to vector<1x8x8xbf16>
    %58 = vector.extract_strided_slice %51 {offsets = [0, 1, 0, 0], sizes = [1, 1, 8, 8], strides = [1, 1, 1, 1]} : vector<1x2x8x8xbf16> to vector<1x1x8x8xbf16>
    %59 = vector.shape_cast %58 : vector<1x1x8x8xbf16> to vector<1x8x8xbf16>
    %c0_16 = arith.constant 0 : index
    %c0_17 = arith.constant 0 : index
    %c0_18 = arith.constant 0 : index
    %60 = vector.load %arg10[%c0_16, %c0_17, %c0_18] : memref<2x8x8xbf16, #tpu.memory_space<vmem>>, vector<1x8x8xbf16>
    %61 = vector.shape_cast %60 : vector<1x8x8xbf16> to vector<8x8xbf16>
    %62 = vector.shape_cast %61 : vector<8x8xbf16> to vector<1x8x8xbf16>
    %c1 = arith.constant 1 : index
    %c0_19 = arith.constant 0 : index
    %c0_20 = arith.constant 0 : index
    %63 = vector.load %arg10[%c1, %c0_19, %c0_20] : memref<2x8x8xbf16, #tpu.memory_space<vmem>>, vector<1x8x8xbf16>
    %64 = vector.shape_cast %63 : vector<1x8x8xbf16> to vector<8x8xbf16>
    %65 = vector.shape_cast %64 : vector<8x8xbf16> to vector<1x8x8xbf16>
    %cst_21 = arith.constant 0.000000e+00 : bf16
    %66 = vector.broadcast %cst_21 : bf16 to vector<1x1x8xbf16>
    %67 = vector.extract_strided_slice %65 {offsets = [0, 0, 0], sizes = [1, 7, 8], strides = [1, 1, 1]} : vector<1x8x8xbf16> to vector<1x7x8xbf16>
    %68 = tpu.concatenate %66, %67 in 1 : vector<1x1x8xbf16>, vector<1x7x8xbf16> -> vector<1x8x8xbf16>
    %cst_22 = arith.constant 0.000000e+00 : bf16
    %69 = vector.broadcast %cst_22 : bf16 to vector<1x1x8xbf16>
    %70 = vector.extract_strided_slice %57 {offsets = [0, 0, 0], sizes = [1, 7, 8], strides = [1, 1, 1]} : vector<1x8x8xbf16> to vector<1x7x8xbf16>
    %71 = tpu.concatenate %69, %70 in 1 : vector<1x1x8xbf16>, vector<1x7x8xbf16> -> vector<1x8x8xbf16>
    %cst_23 = arith.constant 0.000000e+00 : bf16
    %72 = vector.broadcast %cst_23 : bf16 to vector<1x1x8xbf16>
    %73 = vector.extract_strided_slice %59 {offsets = [0, 0, 0], sizes = [1, 7, 8], strides = [1, 1, 1]} : vector<1x8x8xbf16> to vector<1x7x8xbf16>
    %74 = tpu.concatenate %72, %73 in 1 : vector<1x1x8xbf16>, vector<1x7x8xbf16> -> vector<1x8x8xbf16>
    %75 = vector.shape_cast %68 : vector<1x8x8xbf16> to vector<8x8xbf16>
    %c0_24 = arith.constant 0 : index
    %c0_25 = arith.constant 0 : index
    %c0_26 = arith.constant 0 : index
    %76 = vector.load %arg7[%c0_24, %c0_25, %c0_26] : memref<9x8x8xbf16, #tpu.memory_space<vmem>>, vector<1x8x8xbf16>
    %77 = vector.shape_cast %76 : vector<1x8x8xbf16> to vector<8x8xbf16>
    %cst_27 = arith.constant dense<0.000000e+00> : vector<8x8xf32>
    %78 = tpu.matmul %75, %77, %cst_27 {dimension_numbers = #tpu.dot_dimension_numbers<[1], [0], [0], [1], [0, 0, 1, 1], [], []>} : vector<8x8xbf16>, vector<8x8xbf16>, vector<8x8xf32> -> vector<8x8xf32>
    %79 = vector.shape_cast %62 : vector<1x8x8xbf16> to vector<8x8xbf16>
    %c1_28 = arith.constant 1 : index
    %c0_29 = arith.constant 0 : index
    %c0_30 = arith.constant 0 : index
    %80 = vector.load %arg7[%c1_28, %c0_29, %c0_30] : memref<9x8x8xbf16, #tpu.memory_space<vmem>>, vector<1x8x8xbf16>
    %81 = vector.shape_cast %80 : vector<1x8x8xbf16> to vector<8x8xbf16>
    %cst_31 = arith.constant dense<0.000000e+00> : vector<8x8xf32>
    %82 = tpu.matmul %79, %81, %cst_31 {dimension_numbers = #tpu.dot_dimension_numbers<[1], [0], [0], [1], [0, 0, 1, 1], [], []>} : vector<8x8xbf16>, vector<8x8xbf16>, vector<8x8xf32> -> vector<8x8xf32>
    %83 = arith.addf %78, %82 : vector<8x8xf32>
    %84 = vector.shape_cast %65 : vector<1x8x8xbf16> to vector<8x8xbf16>
    %c2 = arith.constant 2 : index
    %c0_32 = arith.constant 0 : index
    %c0_33 = arith.constant 0 : index
    %85 = vector.load %arg7[%c2, %c0_32, %c0_33] : memref<9x8x8xbf16, #tpu.memory_space<vmem>>, vector<1x8x8xbf16>
    %86 = vector.shape_cast %85 : vector<1x8x8xbf16> to vector<8x8xbf16>
    %cst_34 = arith.constant dense<0.000000e+00> : vector<8x8xf32>
    %87 = tpu.matmul %84, %86, %cst_34 {dimension_numbers = #tpu.dot_dimension_numbers<[1], [0], [0], [1], [0, 0, 1, 1], [], []>} : vector<8x8xbf16>, vector<8x8xbf16>, vector<8x8xf32> -> vector<8x8xf32>
    %88 = arith.addf %83, %87 : vector<8x8xf32>
    %89 = vector.shape_cast %71 : vector<1x8x8xbf16> to vector<8x8xbf16>
    %c3 = arith.constant 3 : index
    %c0_35 = arith.constant 0 : index
    %c0_36 = arith.constant 0 : index
    %90 = vector.load %arg7[%c3, %c0_35, %c0_36] : memref<9x8x8xbf16, #tpu.memory_space<vmem>>, vector<1x8x8xbf16>
    %91 = vector.shape_cast %90 : vector<1x8x8xbf16> to vector<8x8xbf16>
    %cst_37 = arith.constant dense<0.000000e+00> : vector<8x8xf32>
    %92 = tpu.matmul %89, %91, %cst_37 {dimension_numbers = #tpu.dot_dimension_numbers<[1], [0], [0], [1], [0, 0, 1, 1], [], []>} : vector<8x8xbf16>, vector<8x8xbf16>, vector<8x8xf32> -> vector<8x8xf32>
    %93 = arith.addf %88, %92 : vector<8x8xf32>
    %94 = vector.shape_cast %53 : vector<1x8x8xbf16> to vector<8x8xbf16>
    %c4 = arith.constant 4 : index
    %c0_38 = arith.constant 0 : index
    %c0_39 = arith.constant 0 : index
    %95 = vector.load %arg7[%c4, %c0_38, %c0_39] : memref<9x8x8xbf16, #tpu.memory_space<vmem>>, vector<1x8x8xbf16>
    %96 = vector.shape_cast %95 : vector<1x8x8xbf16> to vector<8x8xbf16>
    %cst_40 = arith.constant dense<0.000000e+00> : vector<8x8xf32>
    %97 = tpu.matmul %94, %96, %cst_40 {dimension_numbers = #tpu.dot_dimension_numbers<[1], [0], [0], [1], [0, 0, 1, 1], [], []>} : vector<8x8xbf16>, vector<8x8xbf16>, vector<8x8xf32> -> vector<8x8xf32>
    %98 = arith.addf %93, %97 : vector<8x8xf32>
    %99 = vector.shape_cast %57 : vector<1x8x8xbf16> to vector<8x8xbf16>
    %c5 = arith.constant 5 : index
    %c0_41 = arith.constant 0 : index
    %c0_42 = arith.constant 0 : index
    %100 = vector.load %arg7[%c5, %c0_41, %c0_42] : memref<9x8x8xbf16, #tpu.memory_space<vmem>>, vector<1x8x8xbf16>
    %101 = vector.shape_cast %100 : vector<1x8x8xbf16> to vector<8x8xbf16>
    %cst_43 = arith.constant dense<0.000000e+00> : vector<8x8xf32>
    %102 = tpu.matmul %99, %101, %cst_43 {dimension_numbers = #tpu.dot_dimension_numbers<[1], [0], [0], [1], [0, 0, 1, 1], [], []>} : vector<8x8xbf16>, vector<8x8xbf16>, vector<8x8xf32> -> vector<8x8xf32>
    %103 = arith.addf %98, %102 : vector<8x8xf32>
    %104 = vector.shape_cast %74 : vector<1x8x8xbf16> to vector<8x8xbf16>
    %c6 = arith.constant 6 : index
    %c0_44 = arith.constant 0 : index
    %c0_45 = arith.constant 0 : index
    %105 = vector.load %arg7[%c6, %c0_44, %c0_45] : memref<9x8x8xbf16, #tpu.memory_space<vmem>>, vector<1x8x8xbf16>
    %106 = vector.shape_cast %105 : vector<1x8x8xbf16> to vector<8x8xbf16>
    %cst_46 = arith.constant dense<0.000000e+00> : vector<8x8xf32>
    %107 = tpu.matmul %104, %106, %cst_46 {dimension_numbers = #tpu.dot_dimension_numbers<[1], [0], [0], [1], [0, 0, 1, 1], [], []>} : vector<8x8xbf16>, vector<8x8xbf16>, vector<8x8xf32> -> vector<8x8xf32>
    %108 = arith.addf %103, %107 : vector<8x8xf32>
    %109 = vector.shape_cast %55 : vector<1x8x8xbf16> to vector<8x8xbf16>
    %c7 = arith.constant 7 : index
    %c0_47 = arith.constant 0 : index
    %c0_48 = arith.constant 0 : index
    %110 = vector.load %arg7[%c7, %c0_47, %c0_48] : memref<9x8x8xbf16, #tpu.memory_space<vmem>>, vector<1x8x8xbf16>
    %111 = vector.shape_cast %110 : vector<1x8x8xbf16> to vector<8x8xbf16>
    %cst_49 = arith.constant dense<0.000000e+00> : vector<8x8xf32>
    %112 = tpu.matmul %109, %111, %cst_49 {dimension_numbers = #tpu.dot_dimension_numbers<[1], [0], [0], [1], [0, 0, 1, 1], [], []>} : vector<8x8xbf16>, vector<8x8xbf16>, vector<8x8xf32> -> vector<8x8xf32>
    %113 = arith.addf %108, %112 : vector<8x8xf32>
    %114 = vector.shape_cast %59 : vector<1x8x8xbf16> to vector<8x8xbf16>
    %c8 = arith.constant 8 : index
    %c0_50 = arith.constant 0 : index
    %c0_51 = arith.constant 0 : index
    %115 = vector.load %arg7[%c8, %c0_50, %c0_51] : memref<9x8x8xbf16, #tpu.memory_space<vmem>>, vector<1x8x8xbf16>
    %116 = vector.shape_cast %115 : vector<1x8x8xbf16> to vector<8x8xbf16>
    %cst_52 = arith.constant dense<0.000000e+00> : vector<8x8xf32>
    %117 = tpu.matmul %114, %116, %cst_52 {dimension_numbers = #tpu.dot_dimension_numbers<[1], [0], [0], [1], [0, 0, 1, 1], [], []>} : vector<8x8xbf16>, vector<8x8xbf16>, vector<8x8xf32> -> vector<8x8xf32>
    %118 = arith.addf %113, %117 : vector<8x8xf32>
    %c0_53 = arith.constant 0 : index
    %c0_54 = arith.constant 0 : index
    %119 = vector.load %arg8[%c0_53, %c0_54] : memref<1x8xf32, #tpu.memory_space<vmem>>, vector<1x8xf32>
    %120 = vector.broadcast %119 : vector<1x8xf32> to vector<8x8xf32>
    %121 = arith.addf %118, %120 : vector<8x8xf32>
    %122 = arith.negf %121 : vector<8x8xf32>
    %123 = math.exp %122 : vector<8x8xf32>
    %cst_55 = arith.constant 1.000000e+00 : f32
    %124 = vector.broadcast %cst_55 : f32 to vector<8x8xf32>
    %125 = arith.addf %124, %123 : vector<8x8xf32>
    %126 = arith.divf %124, %125 : vector<8x8xf32>
    %127 = arith.mulf %121, %126 : vector<8x8xf32>
    %128 = vector.extract_strided_slice %49 {offsets = [0, 1, 0, 0], sizes = [1, 1, 8, 8], strides = [1, 1, 1, 1]} : vector<1x2x8x8xbf16> to vector<1x1x8x8xbf16>
    %129 = vector.shape_cast %128 : vector<1x1x8x8xbf16> to vector<8x8xbf16>
    %c0_56 = arith.constant 0 : index
    %c0_57 = arith.constant 0 : index
    %c0_58 = arith.constant 0 : index
    %130 = vector.load %arg10[%c0_56, %c0_57, %c0_58] : memref<2x8x8xbf16, #tpu.memory_space<vmem>>, vector<1x8x8xbf16>
    %131 = vector.shape_cast %130 : vector<1x8x8xbf16> to vector<8x8xbf16>
    %132 = vector.shape_cast %129 : vector<8x8xbf16> to vector<1x8x8xbf16>
    tpu.vector_store %arg10[%c0_56, %c0_57, %c0_58], %132 {strides = array<i32>} : memref<2x8x8xbf16, #tpu.memory_space<vmem>>, vector<1x8x8xbf16>,
    %133 = vector.extract_strided_slice %51 {offsets = [0, 1, 0, 0], sizes = [1, 1, 8, 8], strides = [1, 1, 1, 1]} : vector<1x2x8x8xbf16> to vector<1x1x8x8xbf16>
    %134 = vector.shape_cast %133 : vector<1x1x8x8xbf16> to vector<8x8xbf16>
    %c1_59 = arith.constant 1 : index
    %c0_60 = arith.constant 0 : index
    %c0_61 = arith.constant 0 : index
    %135 = vector.load %arg10[%c1_59, %c0_60, %c0_61] : memref<2x8x8xbf16, #tpu.memory_space<vmem>>, vector<1x8x8xbf16>
    %136 = vector.shape_cast %135 : vector<1x8x8xbf16> to vector<8x8xbf16>
    %137 = vector.shape_cast %134 : vector<8x8xbf16> to vector<1x8x8xbf16>
    tpu.vector_store %arg10[%c1_59, %c0_60, %c0_61], %137 {strides = array<i32>} : memref<2x8x8xbf16, #tpu.memory_space<vmem>>, vector<1x8x8xbf16>,
    %c0_62 = arith.constant 0 : index
    %c0_63 = arith.constant 0 : index
    %c0_64 = arith.constant 0 : index
    %138 = vector.load %arg9[%c0_62, %c0_63, %c0_64] : memref<1x8x16xf32, #tpu.memory_space<vmem>>, vector<1x8x8xf32>
    %139 = vector.shape_cast %138 : vector<1x8x8xf32> to vector<8x8xf32>
    %140 = vector.shape_cast %127 : vector<8x8xf32> to vector<1x8x8xf32>
    tpu.vector_store %arg9[%c0_62, %c0_63, %c0_64], %140 {strides = array<i32>} : memref<1x8x16xf32, #tpu.memory_space<vmem>>, vector<1x8x8xf32>,
    %c0_65 = arith.constant 0 : index
    %c0_66 = arith.constant 0 : index
    %c8_67 = arith.constant 8 : index
    %141 = vector.load %arg9[%c0_65, %c0_66, %c8_67] : memref<1x8x16xf32, #tpu.memory_space<vmem>>, vector<1x8x8xf32>
    %142 = vector.shape_cast %141 : vector<1x8x8xf32> to vector<8x8xf32>
    %143 = vector.shape_cast %27 : vector<8x8xf32> to vector<1x8x8xf32>
    tpu.vector_store %arg9[%c0_65, %c0_66, %c8_67], %143 {strides = array<i32>} : memref<1x8x16xf32, #tpu.memory_space<vmem>>, vector<1x8x8xf32>,
    return
  }
  func.func @transform_0(%arg0: i32, %arg1: i32) -> (i32, i32, i32) {
    %c0_i32 = arith.constant 0 : i32
    %c0_i32_0 = arith.constant 0 : i32
    return %arg0, %arg1, %c0_i32 : i32, i32, i32
  }
  func.func @transform_1(%arg0: i32, %arg1: i32) -> (i32, i32) {
    %c0_i32 = arith.constant 0 : i32
    %c0_i32_0 = arith.constant 0 : i32
    %c0_i32_1 = arith.constant 0 : i32
    return %c0_i32, %c0_i32_0 : i32, i32
  }
  func.func @transform_2(%arg0: i32, %arg1: i32) -> (i32, i32) {
    %c0_i32 = arith.constant 0 : i32
    %c0_i32_0 = arith.constant 0 : i32
    %c0_i32_1 = arith.constant 0 : i32
    return %c0_i32, %c0_i32_0 : i32, i32
  }
  func.func @transform_3(%arg0: i32, %arg1: i32) -> (i32, i32) {
    %c0_i32 = arith.constant 0 : i32
    %c0_i32_0 = arith.constant 0 : i32
    %c0_i32_1 = arith.constant 0 : i32
    return %c0_i32, %c0_i32_0 : i32, i32
  }
  func.func @transform_4(%arg0: i32, %arg1: i32) -> (i32, i32) {
    %c0_i32 = arith.constant 0 : i32
    %c0_i32_0 = arith.constant 0 : i32
    %c0_i32_1 = arith.constant 0 : i32
    return %c0_i32, %c0_i32_0 : i32, i32
  }
  func.func @transform_5(%arg0: i32, %arg1: i32) -> (i32, i32, i32) {
    %c0_i32 = arith.constant 0 : i32
    %c0_i32_0 = arith.constant 0 : i32
    %c0_i32_1 = arith.constant 0 : i32
    %c0_i32_2 = arith.constant 0 : i32
    return %c0_i32, %c0_i32_0, %c0_i32_1 : i32, i32, i32
  }
  func.func @transform_6(%arg0: i32, %arg1: i32) -> (i32, i32) {
    %c0_i32 = arith.constant 0 : i32
    %c0_i32_0 = arith.constant 0 : i32
    %c0_i32_1 = arith.constant 0 : i32
    return %c0_i32, %c0_i32_0 : i32, i32
  }
  func.func @transform_7(%arg0: i32, %arg1: i32) -> (i32, i32, i32) {
    %c0_i32 = arith.constant 0 : i32
    %c0_i32_0 = arith.constant 0 : i32
    return %arg0, %arg1, %c0_i32 : i32, i32, i32
  }
}

</mosaic_0001>

<bundles_post_ra>
// kernel: transition_block_forward.1
= control target key start
LH: loop header
LB: loop body
LE: loop exit
PB: predicated region body
PF: predicated region fallthrough
CT: control target
= control target key end

     0   :  { %12 = vsyncpa [#allocation4], 0  ;;  %s1390_s0 = inlined_call_operand.vmem [shape: bf16[2,128,8], index: 0, kind: input, shape index: {}]   ;;  %s1391_s1 = inlined_call_operand.vmem [shape: bf16[4,8], index: 1, kind: input, shape index: {}]   ;;  %s1392_s2 = inlined_call_operand.vmem [shape: f32[1,8], index: 2, kind: input, shape index: {}]   ;;  %s1393_s3 = inlined_call_operand.vmem [shape: bf16[4,8], index: 3, kind: input, shape index: {}]   ;;  %s1394_s4 = inlined_call_operand.vmem [shape: f32[1,8], index: 4, kind: input, shape index: {}]   ;;  %s1395_s5 = inlined_call_operand.vmem [shape: bf16[9,8,8], index: 5, kind: input, shape index: {}]   ;;  %s1396_s6 = inlined_call_operand.vmem [shape: f32[1,8], index: 6, kind: input, shape index: {}]   ;;  %s1397_s7 = inlined_call_operand.hbm [shape: f32[2,64,16], index: 7, kind: output, shape index: {}]  }
   0x1   :  { %14 = vsyncpa [#allocation4 + $0x1], 0  ;;  %s1163_s24 = smov 0   ;;  %s1165_s25 = smov 0  }
   0x2   :  { %s1167_s26 = smov 0   ;;  %s1169_s27 = smov 0  }
   0x3   :  { %s1171_s28 = smov 0   ;;  %s1173_s29 = smov 0  }
   0x4   :  { %s1175_s30 = smov 0   ;;  %s1177_s8 = smov 0  }
   0x5 LB: > { %s877_s9 = sadd.s32 4294967295, %s1118_s8   ;;  %s878_s10 = sadd.s32 4294967294, %s1118_s8   ;;  %s1118_s8 = sphi %s1177_s8, %s20_s8   ;;  %s1114_s30 = sphi %s1175_s30, %s1411_s30   ;;  %s1110_s29 = sphi %s1173_s29, %s1410_s29   ;;  %s1106_s28 = sphi %s1171_s28, %s1409_s28   ;;  %s1102_s27 = sphi %s1169_s27, %s1408_s27   ;;  %s1098_s26 = sphi %s1167_s26, %s1407_s26   ;;  %s1094_s25 = sphi %s1165_s25, %s1406_s25   ;;  %s1090_s24 = sphi %s1163_s24, %s1405_s24  }
   0x6   : > { %s29_s11 = sadd.s32 1, %s1110_s29  ;;  %s32_s12 = sadd.s32 1, %s1114_s30 }
   0x7   : > { %p30_p0 = scmp.ge.s32.totalorder %s29_s11, 8  ;;  %p205_p1 = scmp.ne.s32.totalorder %s1098_s26, %s1094_s25 }
   0x8   : > { %p206_p2 = scmp.eq.s32.totalorder %s877_s9, 15  ;;  %p211_p5 = scmp.ne.s32.totalorder %s1094_s25, %s1090_s24 }
   0x9   : > { %s1413_s11 = smov (%p30_p0, %s29_s11), 0  ;;  %s1415_s12 = smov (!%p30_p0, %s32_s12), %s1114_s30 }
   0xa   : > { %s191_s13 = ssub.s32 %s1110_s29, %s1413_s11  ;;  %p1214_p3 = por %p206_p2, %p205_p1 }
   0xb   : > { %p34_p4 = scmp.ge.s32.totalorder %s1415_s12, 2  ;;  %p212_p6 = scmp.eq.s32.totalorder %s878_s10, 15 }
   0xc   : > { %p881_p7 = scmp.ge.s32.totalorder %s1118_s8, 1  ;;  %p261_p9 = scmp.lt.s32.totalorder %s1118_s8, 17 }
   0xd   : > { %s1417_s12 = smov (%p34_p4, %s1415_s12), 0  ;;  %p1223_p8 = por %p212_p6, %p211_p5 }
   0xe   : > { %1400 = sst [smem:[#allocation6_spill]] %s1417_s12  ;;  %s190_s16 = ssub.s32 %s1114_s30, %s1417_s12 }
   0xf   : > { %s195_s17 = sadd.s32 1, %s1098_s26  ;;  %s192_s18 = sor.u32 %s191_s13, %s190_s16 }
  0x10   : > { %p262_p10 = pnand %p881_p7, %p261_p9  ;;  %p193_p11 = scmp.eq.s32.totalorder %s192_s18, 0 }
  0x11   : > { %s294_s20 = sand.u32 (!%p262_p10), 1, %s1094_s25   ;;  %s883_s21 = sshll.u32 (!%p262_p10), %s1102_s27, 1 }
  0x12   : > { %s1232_s19 = scalar_select %p193_p11, %s1098_s26, %s195_s17  }
  0x13   : > { %265 = sbr.rel (%p262_p10) target bundleno = 514 (0x202), region = 48  ;;  %s882_s22 = sshll.u32 (!%p262_p10), %s294_s20, 3 }
  0x14   : > { %p298_p12 = scmp.lt.s32.totalorder (!%p262_p10), %s1106_s28, 1  ;;  %p300_p13 = scmp.lt.s32.totalorder (!%p262_p10), %s883_s21, 15 }
  0x15   : > { %s1243_s12 = scalar_lea.vmem (!%p262_p10), [#allocation3], %s882_s22  ;;  %p886_p0 = scmp.ne.s32.totalorder (!%p262_p10), %s1102_s27, 0 }
  0x18   : > { %s299_s23 = scalar_select %p298_p12, %s1106_s28, 1 }
  0x19   : > { %s1419_s21 = smov (!%p300_p13, %s883_s21), 15  ;;  %311 = sbr.rel (%p886_p0) target bundleno = 33 (0x21), region = 52 }
  0x1a   : > { %s884_s9 = sshll.u32 %s299_s23, 4 }
  0x1b   : > { %s303_s10 = sadd.s32 %s884_s9, %s1419_s21 }
  0x1c   : > { %s885_s13 = sshll.u32 %s303_s10, 2 }
  0x1d   : > { %s305_s18 = scalar_lea.vmem %s1390_s0, %s885_s13 }
  0x1e   : > { %vm312_vm0 = vcmask 60416   ;;  %v1120_v0 = vmov 0  }
  0x1f   : > { %313 = vst.msk [vmem:[#allocation2] sm:$0xf] %vm312_vm0, %v1120_v0 }
  0x20   : > { %314 = vst.msk [vmem:[#allocation2 + $0x4] sm:$0xf] %vm312_vm0, %v1120_v0 }
  0x21 PF: > { %v922_v1 = vld [vmem:[%s305_s18] sm:$0xff]  ;;  %vm337_vm1 = vcmask 1041408   ;;  %s1121_s22 = smov 124   ;;  %vm333_vm2 = vcmask 31744   ;;  %vm556_vm3 = vcmask 1043456   ;;  %vm552_vm4 = vcmask 64512  }
  0x22   : > { %v315_v2 = vld [vmem:[%s305_s18] sm:$0xff]   ;;  %444 = vrot.lane.b32.xlu0 %v922_v1, %s1121_s22  ;;  %vm771_vm9 = vcmask 60416   ;;  %v906_v54 = vld [vmem:[%s1395_s5 + $0x10] sm:$0xf]  ;;  %vm521_vm14 = vcmask 1040384   ;;  %s1122_s23 = smov 8  }
  0x23   : > { %v374_v3 = vld [vmem:[%s1393_s3] sm:$0x3]  ;;  %v317_v4 = vunpack.c.l.bf16 %v315_v2  ;;  %v318_v5 = vunpack.c.h.bf16 %v315_v2  ;;  %v899_v20 = vld [vmem:[%s1395_s5 + $0x4] sm:$0xf]  ;;  %v642_v56 = vsel %vm556_vm3, %v906_v54, 0  ;;  %s918_s9 = sshll.u32 %s1106_s28, 3 }
  0x24   : > { %v388_v6 = vsel %vm337_vm1, %v374_v3, 0  ;;  %v328_v10 = vld [vmem:[%s1391_s1] sm:$0x3]  ;;  %v558_v21 = vsel %vm556_vm3, %v899_v20, 0  ;;  %vm522_vm15 = vsmask.f32 256  ;;  %s792_s10 = sadd.s32 %s1102_s27, %s918_s9 }
  0x25   : > { %397 = vmatpush.bf16.msra.mxu1 %v388_v6  ;;  %v319_v7 = vmax.f32 %v317_v4, %v318_v5  ;;  %456 = vmatpush.bf16.msra.mxu2 %v388_v6  ;;  %v339_v11 = vsel %vm337_vm1, %v328_v10, 0  ;;  %v1257_v17 = vld [vmem:[%s1394_s4] ss:$0 sm:$0xff]  ;;  %vm1279_vm0 = vmand %vm521_vm14, %vm522_vm15  ;;  %v908_v3 = vld [vmem:[%s1395_s5 + $0x14] sm:$0xf]  ;;  %s919_s13 = sshll.u32 %s792_s10, 3 }
  0x26   : > { %348 = vmatpush.bf16.msra.mxu0 %v339_v11  ;;  %567 = vmatpush.bf16.msra.mxu3 %v558_v21  ;;  %v507_v23 = vld [vmem:[#allocation2] sm:$0xf]  ;;  %v664_v4 = vsel %vm556_vm3, %v908_v3, 0  ;;  %v912_v20 = vld [vmem:[%s1395_s5 + $0x1c] sm:$0xf]  ;;  %s794_s18 = scalar_lea.hbm %s1397_s7, %s919_s13  ;;  %s796_s27 = sshll.u32 %s1243_s12, 4  ;;  %s797_s27 = int_to_ptr.vmem [resolvable:$true] %s796_s27 }
  0x27   : > { %v320_v8 = vpack.c.bf16 %v319_v7, %v319_v7  ;;  %v509_v53 = vld [vmem:[#allocation2 + $0x4] sm:$0xf]  ;;  %v549_v60 = vld [vmem:[%s1395_s5] sm:$0xf]  ;;  %v902_v7 = vld [vmem:[%s1395_s5 + $0x8] sm:$0xf] }
  0x28   : > { %893 = vmatmul.msk.bf16.vlgmr.msra.gmra.mxu1 %vm333_vm2, %v922_v1  ;;  %v511_v57 = vunpack.c.l.b16 %v509_v53  ;;  %v577_v63 = vsel %vm556_vm3, %v549_v60, 0  ;;  %v914_v10 = vld [vmem:[%s1395_s5 + $0x20] sm:$0xf]  ;;  %v708_v21 = vsel %vm556_vm3, %v912_v20, 0  ;;  %s798_s28 = sshll.u32 %s794_s18, 4  ;;  %s1044_s13 = scalar_lea.hbm %s1397_s7, 128  ;;  %s799_s28 = int_to_ptr.hbm [resolvable:$true] %s798_s28 }
  0x29   : > { %v321_v9 = vunpack.c.l.bf16 %v320_v8  ;;  %900 = vmatmul.msk.bf16.vlgmr.msra.gmra.mxu3 %vm552_vm4, %v507_v23  ;;  %v598_v8 = vsel %vm556_vm3, %v902_v7, 0  ;;  %v730_v11 = vsel %vm556_vm3, %v914_v10, 0  ;;  %s1038_s21 = sshra.s32 %s799_s28, 4  ;;  %s1039_s21 = int_to_ptr.hbm [resolvable:$true] %s1038_s21 }
  0x2a   : > { %651 = vmatpush.bf16.msrb.mxu3 %v642_v56  ;;  %v512_v58 = vpack.c.b16 %v511_v57, %v511_v57  ;;  %586 = vmatpush.bf16.msrb.mxu0 %v577_v63  ;;  %p1045_p5 = scmp.lt.s32.totalorder %s1039_s21, %s1397_s7 }
  0x2b   : > { %323 = vrot.lane.b32.xlu0 %v321_v9, %s1121_s22  ;;  %607 = vmatpush.bf16.msrb.mxu1 %v598_v8  ;;  %s1040_s22 = scalar_lea.hbm %s1039_s21, 8 }
  0x2c   : > { %v514_v59 = vshrl.u32 %v512_v58, 16  ;;  %v517_v62 = vshll.u32 %v512_v58, 16  ;;  %p1041_p1 = scmp.ne.s32.totalorder %s1039_s21, %s1040_s22  ;;  %p1046_p6 = scmp.lt.s32.totalorder %s1044_s13, %s1040_s22 }
  0x2e   : > { %v516_v61 = vrot.slane %v514_v59, 7  ;;  %739 = vmatpush.bf16.msra.mxu3 %v730_v11  ;;  %p1042_p2 = pnand %p1041_p1, %p1214_p3  ;;  %p1047_p7 = por %p1046_p6, %p1045_p5 }
  0x30   : > { %v519_v0 = vor.u32 %v517_v62, %v516_v61  ;;  %p1043_p4 = pneg %p1042_p2 }
  0x32   : > { %v524_v2 = vsel %vm1279_vm0, 0, %v519_v0  ;;  %p1048_p9 = pnand %p1047_p7, %p1043_p4 }
  0x38   : > { %903 = vmatmul.msk.bf16.vlgmr.msrb.gmra.mxu1 %vm552_vm4, %v509_v53 }
  0x94   : > { %v445_v12 = vpop.permute.xlu0 %444 }
  0x95   : > { %896 = vmatmul.msk.bf16.vlgmr.msra.gmra.mxu2 %vm333_vm2, %v445_v12 }
  0x9d   : > { %v324_v13 = vpop.permute.xlu0 %323 }
  0x9e   : > { %v326_v14 = vmax.f32 %v321_v9, %v324_v13 }
  0xa0   : > { %v327_v15 = vpack.c.bf16 %v326_v14, %v326_v14  ;;  %v904_v14 = vld [vmem:[%s1395_s5 + $0xc] sm:$0xf] }
  0xa2   : > { %887 = vmatmul.msk.bf16.vlgmr.msra.gmra.mxu0 %vm333_vm2, %v327_v15  ;;  %v620_v15 = vsel %vm556_vm3, %v904_v14, 0 }
  0xa3   : > { %673 = vmatpush.bf16.msra.mxu0 %v664_v4  ;;  %629 = vmatpush.bf16.msrb.mxu2 %v620_v15 }
  0xa5   : > { %v399_v16 = vpop.f32.mrf.mxu1 }
  0xa6   : > { %v400_v35 = vadd.f32 %v1257_v17, %v399_v16 }
  0xa7   : > { %717 = vmatpush.bf16.msra.mxu2 %v708_v21 }
  0xa8   : > { %v894_v39 = vmul.f32 -1.442695, %v400_v35 }
  0xad   : > { %v401_v18 = vpop.f32.mrf.mxu1 }
  0xae   : > { %v402_v19 = vadd.f32 %v1257_v17, %v401_v18 }
  0xb0   : > { %v895_v22 = vmul.f32 -1.442695, %v402_v19 }
  0xb2   : > { %1000 = vpow2.f32 %v895_v22  ;;  %901 = vmatmul.msk.bf16.vlgmr.msrb.gmra.mxu0 %vm552_vm4, %v524_v2 }
  0xb8   : > { %v1001_v24 = vpop.eup %1000 }
  0xb9   : > { %v411_v25 = vadd.f32 1.0, %v1001_v24 }
  0xbb   : > { %1002 = vrcp.f32 %v411_v25  ;;  %v438_v28 = vand.u32 2147483648, %v411_v25  ;;  %vm432_vm5 = vweird.f32 %v411_v25  ;;  %v436_v30 = vand.u32 2147483647, %v411_v25 }
  0xbc   : > { %1004 = vpow2.f32 %v894_v39 }
  0xbd   : > { %v439_v32 = vor.u32 1.1754944e-38, %v438_v28  ;;  %vm437_vm8 = vcmp.eq.f32.partialorder %v436_v30, 8.507059e+37 }
  0xc1   : > { %v1003_v26 = vpop.eup %1002 }
  0xc2   : > { %v428_v27 = vmul.f32 %v1003_v26, %v411_v25  ;;  %vm433_vm6 = vweird.f32 %v1003_v26  ;;  %v1005_v40 = vpop.eup %1004 }
  0xc3   : > { %vm434_vm7 = vmor %vm432_vm5, %vm433_vm6  ;;  %v410_v41 = vadd.f32 1.0, %v1005_v40 }
  0xc4   : > { %v429_v29 = vsub.f32 1.0, %v428_v27  ;;  %v998_v27 = vld [vmem:[%s1392_s2] ss:$0 sm:$0xff] }
  0xc5   : > { %1006 = vrcp.f32 %v410_v41  ;;  %vm417_vm10 = vweird.f32 %v410_v41  ;;  %v423_v46 = vand.u32 2147483648, %v410_v41  ;;  %v421_v48 = vand.u32 2147483647, %v410_v41 }
  0xc6   : > { %v430_v31 = vmul.f32 %v1003_v26, %v429_v29 }
  0xc7   : > { %v424_v49 = vor.u32 1.1754944e-38, %v423_v46  ;;  %vm422_vm13 = vcmp.eq.f32.partialorder %v421_v48, 8.507059e+37 }
  0xc8   : > { %v431_v33 = vadd.f32 %v1003_v26, %v430_v31 }
  0xca   : > { %v435_v34 = vsel %vm434_vm7, %v1003_v26, %v431_v33 }
  0xcb   : > { %v440_v36 = vsel %vm437_vm8, %v439_v32, %v435_v34  ;;  %v1007_v42 = vpop.eup %1006 }
  0xcc   : > { %v443_v37 = vmul.f32 %v440_v36, %v402_v19  ;;  %v413_v43 = vmul.f32 %v1007_v42, %v410_v41  ;;  %vm418_vm11 = vweird.f32 %v1007_v42 }
  0xcd   : > { %vm419_vm12 = vmor %vm417_vm10, %vm418_vm11 }
  0xce   : > { %v1266_v38 = vpack.c.bf16 %v443_v37, %v443_v37  ;;  %v414_v44 = vsub.f32 1.0, %v413_v43  ;;  %v1322_v43 = vpop.f32.mrf.mxu3 }
  0xd0   : > { %772 = vst.msk [vmem:[#allocation2] sm:$0xf] %vm771_vm9, %v1266_v38  ;;  %v415_v45 = vmul.f32 %v1007_v42, %v414_v44 }
  0xd2   : > { %v416_v47 = vadd.f32 %v1007_v42, %v415_v45 }
  0xd4   : > { %v420_v50 = vsel %vm419_vm12, %v1007_v42, %v416_v47 }
  0xd5   : > { %v425_v51 = vsel %vm422_vm13, %v424_v49, %v420_v50 }
  0xd6   : > { %v442_v52 = vmul.f32 %v425_v51, %v400_v35  ;;  %v571_v58 = vpop.f32.mrf.mxu3 }
  0xd8   : > { %v503_v55 = vpack.c.bf16 %v442_v52, %v442_v52 }
  0xda   : > { %907 = vmatmul.msk.bf16.vlgmr.msrb.gmra.mxu3 %vm552_vm4, %v503_v55 }
 0x118   : > { %v458_v5 = vpop.f32.mrf.mxu2 }
 0x119   : > { %v459_v6 = vadd.f32 %v1257_v17, %v458_v5 }
 0x11b   : > { %v897_v9 = vmul.f32 -1.442695, %v459_v6 }
 0x11d   : > { %1008 = vpow2.f32 %v897_v9 }
 0x11f   : > { %v350_v28 = vpop.f32.mrf.mxu0 }
 0x120   : > { %v460_v12 = vpop.f32.mrf.mxu2  ;;  %v1319_v31 = vadd.f32 %v998_v27, %v350_v28 }
 0x121   : > { %v1301_v13 = vadd.f32 %v1257_v17, %v460_v12  ;;  %v910_v17 = vld [vmem:[%s1395_s5 + $0x18] sm:$0xf] }
 0x122   : > { %v686_v22 = vsel %vm556_vm3, %v910_v17, 0  ;;  %v888_v34 = vmul.f32 -1.442695, %v1319_v31 }
 0x123   : > { %v1009_v16 = vpop.eup %1008  ;;  %v898_v18 = vmul.f32 -1.442695, %v1301_v13  ;;  %695 = vmatpush.bf16.msra.mxu1 %v686_v22 }
 0x124   : > { %v469_v19 = vadd.f32 1.0, %v1009_v16 }
 0x125   : > { %1010 = vpow2.f32 %v898_v18 }
 0x126   : > { %1012 = vrcp.f32 %v469_v19  ;;  %v482_v30 = vand.u32 2147483648, %v469_v19  ;;  %v480_v33 = vand.u32 2147483647, %v469_v19  ;;  %vm476_vm2 = vweird.f32 %v469_v19 }
 0x127   : > { %v352_v42 = vpop.f32.mrf.mxu0 }
 0x128   : > { %v483_v37 = vor.u32 1.1754944e-38, %v482_v30  ;;  %vm481_vm5 = vcmp.eq.f32.partialorder %v480_v33, 8.507059e+37  ;;  %v999_v42 = vld [vmem:[%s1396_s6] ss:$0 sm:$0xff] }
 0x12b   : > { %v1011_v23 = vpop.eup %1010 }
 0x12c   : > { %v1013_v24 = vpop.eup %1012  ;;  %v470_v25 = vadd.f32 1.0, %v1011_v23 }
 0x12d   : > { %v472_v26 = vmul.f32 %v1013_v24, %v469_v19  ;;  %vm477_vm1 = vweird.f32 %v1013_v24 }
 0x12e   : > { %1014 = vrcp.f32 %v470_v25  ;;  %vm478_vm3 = vmor %vm476_vm2, %vm477_vm1  ;;  %v497_v46 = vand.u32 2147483648, %v470_v25  ;;  %v495_v49 = vand.u32 2147483647, %v470_v25  ;;  %vm491_vm7 = vweird.f32 %v470_v25 }
 0x12f   : > { %v473_v29 = vsub.f32 1.0, %v472_v26  ;;  %1016 = vpow2.f32 %v888_v34  ;;  %v588_v22 = vpop.f32.mrf.mxu0  ;;  %vm779_vm2 = vcmask 130112  }
 0x130   : > { %v498_v54 = vor.u32 1.1754944e-38, %v497_v46  ;;  %vm496_vm10 = vcmp.eq.f32.partialorder %v495_v49, 8.507059e+37  ;;  %v589_v1 = vadd.f32 %v588_v22, %v1322_v43 }
 0x131   : > { %v474_v32 = vmul.f32 %v1013_v24, %v473_v29 }
 0x133   : > { %v475_v35 = vadd.f32 %v1013_v24, %v474_v32 }
 0x134   : > { %v1015_v36 = vpop.eup %1014 }
 0x135   : > { %v479_v39 = vsel %vm478_vm3, %v1013_v24, %v475_v35  ;;  %v487_v40 = vmul.f32 %v1015_v36, %v470_v25  ;;  %vm492_vm6 = vweird.f32 %v1015_v36  ;;  %v1017_v50 = vpop.eup %1016  ;;  %v609_v25 = vpop.f32.mrf.mxu1 }
 0x136   : > { %v484_v41 = vsel %vm481_vm5, %v483_v37, %v479_v39  ;;  %v357_v53 = vadd.f32 1.0, %v1017_v50  ;;  %vm493_vm8 = vmor %vm491_vm7, %vm492_vm6  ;;  %v613_v30 = vadd.f32 %v609_v25, %v589_v1 }
 0x137   : > { %v501_v44 = vmul.f32 %v484_v41, %v459_v6  ;;  %v488_v45 = vsub.f32 1.0, %v487_v40  ;;  %v590_v24 = vpop.f32.mrf.mxu0 }
 0x138   : > { %1018 = vrcp.f32 %v357_v53  ;;  %v369_v7 = vand.u32 2147483648, %v357_v53  ;;  %vm363_vm11 = vweird.f32 %v357_v53  ;;  %v367_v9 = vand.u32 2147483647, %v357_v53 }
 0x139   : > { %v505_v47 = vpack.c.bf16 %v501_v44, %v501_v44  ;;  %v489_v48 = vmul.f32 %v1015_v36, %v488_v45 }
 0x13a   : > { %v370_v14 = vor.u32 1.1754944e-38, %v369_v7  ;;  %vm368_vm13 = vcmp.eq.f32.partialorder %v367_v9, 8.507059e+37 }
 0x13b   : > { %v526_v51 = vunpack.c.l.b16 %v505_v47  ;;  %v490_v52 = vadd.f32 %v1015_v36, %v489_v48  ;;  %909 = vmatmul.msk.bf16.vlgmr.msra.gmra.mxu0 %vm552_vm4, %v505_v47 }
 0x13d   : > { %v527_v55 = vpack.c.b16 %v526_v51, %v526_v51  ;;  %v494_v56 = vsel %vm493_vm8, %v1015_v36, %v490_v52  ;;  %v611_v26 = vpop.f32.mrf.mxu1 }
 0x13e   : > { %v499_v57 = vsel %vm496_vm10, %v498_v54, %v494_v56  ;;  %v1019_v0 = vpop.eup %1018 }
 0x13f   : > { %v529_v59 = vshrl.u32 %v527_v55, 16  ;;  %v502_v60 = vmul.f32 %v499_v57, %v1301_v13  ;;  %v532_v63 = vshll.u32 %v527_v55, 16  ;;  %v359_v4 = vmul.f32 %v1019_v0, %v357_v53 }
 0x140   : > { %vm364_vm12 = vweird.f32 %v1019_v0 }
 0x141   : > { %v506_v61 = vpack.c.bf16 %v502_v60, %v502_v60  ;;  %v531_v62 = vrot.slane %v529_v59, 7  ;;  %v360_v8 = vsub.f32 1.0, %v359_v4 }
 0x143   : > { %v538_v2 = vunpack.c.l.b16 %v506_v61  ;;  %773 = vst.msk [vmem:[#allocation2 + $0x4] sm:$0xf] %vm771_vm9, %v506_v61  ;;  %915 = vmatmul.msk.bf16.vlgmr.msra.gmra.mxu3 %vm552_vm4, %v506_v61  ;;  %v534_v3 = vor.u32 %v532_v63, %v531_v62  ;;  %v361_v11 = vmul.f32 %v1019_v0, %v360_v8  ;;  %vm365_vm9 = vmor %vm363_vm11, %vm364_vm12 }
 0x145   : > { %v539_v5 = vpack.c.b16 %v538_v2, %v538_v2  ;;  %v536_v6 = vsel %vm1279_vm0, 0, %v534_v3  ;;  %v362_v15 = vadd.f32 %v1019_v0, %v361_v11 }
 0x146   : > { %905 = vmatmul.msk.bf16.vlgmr.msrb.gmra.mxu2 %vm552_vm4, %v536_v6 }
 0x147   : > { %v541_v10 = vshrl.u32 %v539_v5, 16  ;;  %v544_v13 = vshll.u32 %v539_v5, 16  ;;  %v366_v18 = vsel %vm365_vm9, %v1019_v0, %v362_v15 }
 0x148   : > { %v371_v20 = vsel %vm368_vm13, %v370_v14, %v366_v18 }
 0x149   : > { %v543_v12 = vrot.slane %v541_v10, 7  ;;  %v373_v17 = vmul.f32 %v371_v20, %v1319_v31 }
 0x14b   : > { %v546_v16 = vor.u32 %v544_v13, %v543_v12  ;;  %776 = vrot.lane.b32.xlu1 %v373_v17, %s1122_s23  ;;  %s782_s23 = scalar_lea.sflag [#allocation4], %s294_s20 }
 0x14d   : > { %v548_v19 = vsel %vm1279_vm0, 0, %v546_v16 }
 0x14e   : > { %911 = vmatmul.msk.bf16.vlgmr.msra.gmra.mxu1 %vm552_vm4, %v548_v19 }
 0x156   : > { %913 = vmatmul.msk.bf16.vlgmr.msra.gmra.mxu2 %vm552_vm4, %v1266_v38 }
 0x15d   : > { %v653_v21 = vpop.f32.mrf.mxu3 }
 0x165   : > { %v655_v23 = vpop.f32.mrf.mxu3 }
 0x1b8   : > { %v675_v27 = vpop.f32.mrf.mxu0 }
 0x1bd   : > { %v777_v60 = vpop.permute.xlu1 %776 }
 0x1c0   : > { %v677_v28 = vpop.f32.mrf.mxu0 }
 0x1c6   : > { %v741_v29 = vpop.f32.mrf.mxu3 }
 0x1c9   : > { %v631_v32 = vpop.f32.mrf.mxu2 }
 0x1ca   : > { %v635_v33 = vadd.f32 %v631_v32, %v613_v30 }
 0x1cb   : > { %v697_v31 = vpop.f32.mrf.mxu1 }
 0x1cc   : > { %v657_v34 = vadd.f32 %v653_v21, %v635_v33 }
 0x1ce   : > { %v743_v35 = vpop.f32.mrf.mxu3  ;;  %v679_v37 = vadd.f32 %v675_v27, %v657_v34 }
 0x1d0   : > { %v701_v39 = vadd.f32 %v697_v31, %v679_v37 }
 0x1d1   : > { %v633_v36 = vpop.f32.mrf.mxu2 }
 0x1d3   : > { %v699_v38 = vpop.f32.mrf.mxu1 }
 0x1d9   : > { %v719_v40 = vpop.f32.mrf.mxu2 }
 0x1da   : > { %v723_v41 = vadd.f32 %v719_v40, %v701_v39 }
 0x1dc   : > { %v745_v43 = vadd.f32 %v741_v29, %v723_v41 }
 0x1de   : > { %v750_v44 = vadd.f32 %v999_v42, %v745_v43 }
 0x1e0   : > { %v916_v45 = vmul.f32 -1.442695, %v750_v44 }
 0x1e1   : > { %v721_v46 = vpop.f32.mrf.mxu2 }
 0x1e2   : > { %1020 = vpow2.f32 %v916_v45 }
 0x1e8   : > { %v1021_v47 = vpop.eup %1020 }
 0x1e9   : > { %v754_v48 = vadd.f32 1.0, %v1021_v47 }
 0x1eb   : > { %1022 = vrcp.f32 %v754_v48  ;;  %v766_v52 = vand.u32 2147483648, %v754_v48  ;;  %v764_v54 = vand.u32 2147483647, %v754_v48  ;;  %vm760_vm15 = vweird.f32 %v754_v48 }
 0x1ed   : > { %v767_v56 = vor.u32 1.1754944e-38, %v766_v52  ;;  %vm765_vm1 = vcmp.eq.f32.partialorder %v764_v54, 8.507059e+37 }
 0x1f1   : > { %v1023_v49 = vpop.eup %1022 }
 0x1f2   : > { %v756_v50 = vmul.f32 %v1023_v49, %v754_v48  ;;  %vm761_vm14 = vweird.f32 %v1023_v49 }
 0x1f3   : > { %vm762_vm0 = vmor %vm760_vm15, %vm761_vm14 }
 0x1f4   : > { %v757_v51 = vsub.f32 1.0, %v756_v50 }
 0x1f6   : > { %v758_v53 = vmul.f32 %v1023_v49, %v757_v51 }
 0x1f8   : > { %v759_v55 = vadd.f32 %v1023_v49, %v758_v53 }
 0x1fa   : > { %v763_v57 = vsel %vm762_vm0, %v1023_v49, %v759_v55 }
 0x1fb   : > { %v768_v58 = vsel %vm765_vm1, %v767_v56, %v763_v57 }
 0x1fc   : > { %v770_v59 = vmul.f32 %v768_v58, %v750_v44 }
 0x1fe   : > { %774 = vst.msk [vmem:[%s1243_s12] sm:$0xff] %vm552_vm4, %v770_v59 }
 0x1ff   : > { %780 = vst.msk [vmem:[%s1243_s12] sm:$0xff] %vm779_vm2, %v777_v60 }
 0x200   : > { %1051 = shalt.err (!%p1048_p9)
}
 0x201   : > { %923 = dma.vmem_to_hbm [thread:$0]  (%p1214_p3), %s797_s27, 128, %s799_s28, %s782_s23  }
 0x202 PF: > { %p929_p10 = scmp.ge.s32.totalorder %s1118_s8, 2  ;;  %s810_s12 = sand.u32 1, %s1090_s24  }
 0x203   : > { %s811_s20 = scalar_lea.sflag [#allocation4], %s810_s12 }
 0x204   : > { %p926_p11 = pnand %p929_p10, %p1223_p8 }
 0x206   : > { %p927_p12 = pneg %p926_p11 }
 0x208   : > { %1085 = dma.done.wait (%p927_p12), %s811_s20, 128  }
 0x209   : > { %1087 = vsyncadd (%p927_p12), %s811_s20, 4294967168  ;;  %s20_s8 = sadd.s32 1, %s1118_s8   ;;  %s1404_s14 = sld [smem:[#allocation6_spill]] }
 0x20a   : > { %p17_p13 = scmp.ge.s32.totalorder %s20_s8, 18   ;;  %s1405_s24 = smov %s1094_s25 }
 0x20b   : > { %s1406_s25 = smov %s1098_s26  ;;  %s1407_s26 = smov %s1232_s19 }
 0x20c   : > { %s1408_s27 = smov %s1110_s29  ;;  %s1409_s28 = smov %s1114_s30 }
 0x20d   : > { %s1410_s29 = smov %s1413_s11  ;;  %19 = sbr.rel (!%p17_p13) target bundleno = 5 (0x5), region = 96 }
 0x20f   : > { %s1411_s30 = smov %s1404_s14 }
 0x212   :  { %817 = vsyncpa [#allocation4], 1 }
 0x213   :  { %819 = vsyncpa [#allocation4 + $0x1], 1 }

</bundles_post_ra>
